<compile_context>
chip_gen: v7x
topology: tpu7x:2x2x1
jax: 0.10.0
libtpu: 0.0.40
codegen_flags: <defaults>
</compile_context>

<pallas_src>
import jax
import jax.numpy as jnp
from jax.experimental import pallas as pl
from jax.experimental.pallas import tpu as pltpu

INPUT_SIZE = 28 * 28   # 784  (K, full-dim block -> no padding needed)
NUM_CLASSES = 10
N_PAD = 128            # lane-dense output width (unmasked vst, full-lane VPU)


def _round_up(x, m):
    return (x + m - 1) // m * m


def _linear_kernel(x_ref, w_ref, b_ref, o_ref):
    # x_ref: (TILE_B, 784)  w_ref: (784, N_PAD)  b_ref: (1, N_PAD) f32
    # o_ref: (TILE_B, N_PAD) f32
    acc = jnp.dot(x_ref[...], w_ref[...], preferred_element_type=jnp.float32)
    o_ref[...] = acc + b_ref[...]


def mnist_model_forward(xb, w_t, b, *, tile_b=None, compute_dtype=jnp.bfloat16):
    """Forward pass of MnistModel.

    xb : (B, 1, 28, 28) float32 (NCHW, like PyTorch)
    w_t: (784, 10)      float32 (transposed nn.Linear weight)
    b  : (10,)          float32
    compute_dtype: dtype used for x / W on the MXU (accumulation is always
                   f32).  bf16 halves the dominant HBM read stream; use
                   jnp.float32 for bit-tight parity with an f32 reference.
    returns (B, 10) float32 logits.
    """
    B = xb.shape[0]
    compute_dtype = jnp.dtype(compute_dtype)
    sub = 16 if compute_dtype == jnp.bfloat16 else 8  # sublane packing

    # x: reshape + cast only; K is NOT padded (784 = full block dim).
    x2d = xb.reshape(B, INPUT_SIZE).astype(compute_dtype)

    # Weight / bias padded only along the tiny N axis (10 -> 128): negligible
    # bytes, keeps the output store lane-dense and the bias add full-lane.
    w_p = jnp.pad(w_t.astype(compute_dtype), ((0, 0), (0, N_PAD - NUM_CLASSES)))
    b_p = jnp.pad(b.astype(jnp.float32).reshape(1, NUM_CLASSES),
                  ((0, 0), (0, N_PAD - NUM_CLASSES)))

    if tile_b is None:
        if B <= 256:
            tile_b = _round_up(B, sub)                 # single grid step
        elif B <= 2048:
            # >= 2 grid steps so the "parallel" axis feeds both v7x TCs.
            tile_b = _round_up(pl.cdiv(B, 2), sub)
        else:
            # Large batches: big tiles amortize per-step overhead (v6e),
            # while staying inside v5e's 16 MiB scoped VMEM default.
            tile_b = 2048 if compute_dtype == jnp.bfloat16 else 1024
    else:
        tile_b = _round_up(tile_b, sub)

    B_pad = _round_up(B, tile_b)
    x_p = x2d
    if B_pad != B:
        # Single fused pad on the batch tail only (zeros are inert; padded
        # rows are sliced off below).
        x_p = jnp.pad(x2d, ((0, B_pad - B), (0, 0)))

    num_tiles = B_pad // tile_b
    itemsize = compute_dtype.itemsize

    cost = pl.CostEstimate(
        flops=2 * B * INPUT_SIZE * NUM_CLASSES,        # real useful flops
        transcendentals=0,
        bytes_accessed=(B_pad * INPUT_SIZE * itemsize  # x read
                        + INPUT_SIZE * N_PAD * itemsize  # W read (resident)
                        + N_PAD * 4                      # bias read
                        + B_pad * N_PAD * 4),            # output write
    )

    out = pl.pallas_call(
        _linear_kernel,
        out_shape=jax.ShapeDtypeStruct((B_pad, N_PAD), jnp.float32),
        grid_spec=pl.GridSpec(
            grid=(num_tiles,),
            in_specs=[
                # x tile: (tile_b, 784); last dim = full array dim.
                pl.BlockSpec((tile_b, INPUT_SIZE), lambda i: (i, 0)),
                # Weight / bias are grid-invariant -> single-buffered.
                pl.BlockSpec((INPUT_SIZE, N_PAD), lambda i: (0, 0),
                             pipeline_mode=pl.Buffered(1)),
                pl.BlockSpec((1, N_PAD), lambda i: (0, 0),
                             pipeline_mode=pl.Buffered(1)),
            ],
            out_specs=pl.BlockSpec((tile_b, N_PAD), lambda i: (i, 0)),
        ),
        compiler_params=pltpu.CompilerParams(
            dimension_semantics=("parallel",)),   # v7x: shard tiles over 2 TCs
        cost_estimate=cost,
    )(x_p, w_p, b_p)

    # Slice away batch-tail + lane padding to match nn.Linear(784, 10) output.
    return out[:B, :NUM_CLASSES]


def init_params(key):
    """Deterministic init matching nn.Linear(784, 10) shapes.

    PyTorch stores weight as (out_features, in_features) = (10, 784);
    we return its transpose (784, 10) for the kernel, plus bias (10,).
    """
    kw, kb = jax.random.split(key)
    bound = 1.0 / jnp.sqrt(jnp.float32(INPUT_SIZE))
    w = jax.random.uniform(kw, (NUM_CLASSES, INPUT_SIZE),
                           minval=-bound, maxval=bound, dtype=jnp.float32)
    b = jax.random.uniform(kb, (NUM_CLASSES,),
                           minval=-bound, maxval=bound, dtype=jnp.float32)
    return w.T, b


if __name__ == "__main__":
    key = jax.random.PRNGKey(0)
    k_x, k_p = jax.random.split(key)
    w_t, b = init_params(k_p)

    # --- Small batch, f32 compute path: exact parity with the reference ---
    B = 8
    xb = jax.random.normal(k_x, (B, 1, 28, 28), dtype=jnp.float32)
    ref = xb.reshape(B, INPUT_SIZE) @ w_t + b

    out_f32 = mnist_model_forward(xb, w_t, b, compute_dtype=jnp.float32)
    jax.block_until_ready(out_f32)
    assert out_f32.shape == (B, NUM_CLASSES)
    assert jnp.allclose(out_f32, ref, atol=1e-5, rtol=1e-5)

    # --- Small batch, default bf16 input path (f32 accumulation) ---
    out_bf16 = mnist_model_forward(xb, w_t, b)
    jax.block_until_ready(out_bf16)
    assert out_bf16.shape == (B, NUM_CLASSES)
    assert jnp.allclose(out_bf16, ref, atol=5e-2, rtol=5e-2)

    # --- Multi-tile case: B=300 -> default tile_b=160, 2 grid steps, tail
    #     pad 20 rows (sliced off).  Exercises batch tiling + tail padding. ---
    B2 = 300
    xb2 = jax.random.normal(jax.random.PRNGKey(1), (B2, 1, 28, 28),
                            dtype=jnp.float32)
    ref2 = xb2.reshape(B2, INPUT_SIZE) @ w_t + b

    out2 = mnist_model_forward(xb2, w_t, b)                    # bf16 default
    jax.block_until_ready(out2)
    assert out2.shape == (B2, NUM_CLASSES)
    assert jnp.allclose(out2, ref2, atol=5e-2, rtol=5e-2)

    out2_f32 = mnist_model_forward(xb2, w_t, b, tile_b=128,    # explicit tiles
                                   compute_dtype=jnp.float32)
    jax.block_until_ready(out2_f32)
    assert out2_f32.shape == (B2, NUM_CLASSES)
    assert jnp.allclose(out2_f32, ref2, atol=1e-5, rtol=1e-5)

    print("KERNEL_OK")
</pallas_src>

<mosaic_0001>
module attributes {stable_mosaic.version = 11 : i64} {
  func.func @_linear_kernel(%arg0: i32, %arg1: memref<8x784xf32, #tpu.memory_space<vmem>>, %arg2: memref<784x128xf32, #tpu.memory_space<vmem>>, %arg3: memref<1x128xf32, #tpu.memory_space<vmem>>, %arg4: memref<8x128xf32, #tpu.memory_space<vmem>>) attributes {dimension_semantics = [#tpu.dimension_semantics<parallel>], iteration_bounds = array<i64: 1>, scalar_prefetch = 0 : i64, scratch_operands = 0 : i64, tpu.core_type = #tpu.core_type<tc>, window_params = [{transform_indices = @transform_0, window_bounds = array<i64: 8, 784>}, {pipeline_mode = #tpu.pipeline_mode<synchronous>, transform_indices = @transform_1, window_bounds = array<i64: 784, 128>}, {pipeline_mode = #tpu.pipeline_mode<synchronous>, transform_indices = @transform_2, window_bounds = array<i64: 1, 128>}, {transform_indices = @transform_3, window_bounds = array<i64: 8, 128>}]} {
    %c0 = arith.constant 0 : index
    %c0_0 = arith.constant 0 : index
    %0 = vector.load %arg1[%c0, %c0_0] : memref<8x784xf32, #tpu.memory_space<vmem>>, vector<8x784xf32>
    %c0_1 = arith.constant 0 : index
    %c0_2 = arith.constant 0 : index
    %1 = vector.load %arg2[%c0_1, %c0_2] : memref<784x128xf32, #tpu.memory_space<vmem>>, vector<784x128xf32>
    %cst = arith.constant dense<0.000000e+00> : vector<8x128xf32>
    %2 = tpu.matmul %0, %1, %cst {dimension_numbers = #tpu.dot_dimension_numbers<[1], [0], [0], [1], [0, 0, 1, 1], [], []>} : vector<8x784xf32>, vector<784x128xf32>, vector<8x128xf32> -> vector<8x128xf32>
    %c0_3 = arith.constant 0 : index
    %c0_4 = arith.constant 0 : index
    %3 = vector.load %arg3[%c0_3, %c0_4] : memref<1x128xf32, #tpu.memory_space<vmem>>, vector<1x128xf32>
    %4 = vector.broadcast %3 : vector<1x128xf32> to vector<8x128xf32>
    %5 = arith.addf %2, %4 : vector<8x128xf32>
    %c0_5 = arith.constant 0 : index
    %c0_6 = arith.constant 0 : index
    %6 = vector.load %arg4[%c0_5, %c0_6] : memref<8x128xf32, #tpu.memory_space<vmem>>, vector<8x128xf32>
    tpu.vector_store %arg4[%c0_5, %c0_6], %5 {strides = array<i32>} : memref<8x128xf32, #tpu.memory_space<vmem>>, vector<8x128xf32>,
    return
  }
  func.func @transform_0(%arg0: i32) -> (i32, i32) {
    %c0_i32 = arith.constant 0 : i32
    %c0_i32_0 = arith.constant 0 : i32
    return %arg0, %c0_i32 : i32, i32
  }
  func.func @transform_1(%arg0: i32) -> (i32, i32) {
    %c0_i32 = arith.constant 0 : i32
    %c0_i32_0 = arith.constant 0 : i32
    %c0_i32_1 = arith.constant 0 : i32
    return %c0_i32, %c0_i32_0 : i32, i32
  }
  func.func @transform_2(%arg0: i32) -> (i32, i32) {
    %c0_i32 = arith.constant 0 : i32
    %c0_i32_0 = arith.constant 0 : i32
    %c0_i32_1 = arith.constant 0 : i32
    return %c0_i32, %c0_i32_0 : i32, i32
  }
  func.func @transform_3(%arg0: i32) -> (i32, i32) {
    %c0_i32 = arith.constant 0 : i32
    %c0_i32_0 = arith.constant 0 : i32
    return %arg0, %c0_i32 : i32, i32
  }
}

</mosaic_0001>

<bundles_post_ra>
// kernel: tpu_custom_call.1
= control target key start
LH: loop header
LB: loop body
LE: loop exit
PB: predicated region body
PF: predicated region fallthrough
CT: control target
= control target key end

     0   :  { %8 = vsyncpa [#allocation3], 0  ;;  %s824_s0 = inlined_call_operand.hbm [shape: f32[8,784], index: 0, kind: input, shape index: {}]   ;;  %s825_s1 = inlined_call_operand.hbm [shape: f32[784,128], index: 1, kind: input, shape index: {}]   ;;  %s826_s2 = inlined_call_operand.vmem [shape: f32[1,128], index: 2, kind: input, shape index: {}]   ;;  %s827_s3 = inlined_call_operand.hbm [shape: f32[8,128], index: 3, kind: output, shape index: {}]  }
   0x1   :  { %9 = vsyncpa [#allocation6], 0 }
   0x2   :  { %10 = vsyncpa [#allocation4], 0  ;;  %s750_s12 = smov [#allocation2]   ;;  %s751_s14 = smov [#allocation5]  }
   0x3   :  { %s17_s13 = sshll.u32 %s750_s12, 4  ;;  %s26_s15 = sshll.u32 %s751_s14, 4  ;;  %s18_s13 = int_to_ptr.vmem [resolvable:$true] %s17_s13  ;;  %s778_s15 = int_to_ptr.vmem [resolvable:$true] %s26_s15 }
   0x4   :  { %s678_s18 = scalar_lea.hbm %s824_s0, 896 }
   0x5   :  { %p679_p0 = scmp.ne.s32.totalorder %s824_s0, %s678_s18  ;;  %p682_p1 = scmp.lt.u32.totalorder %s678_s18, %s824_s0 }
   0x7   :  { %p684_p2 = pnand %p682_p1, %p679_p0 }
   0x9   :  { %687 = shalt.err (!%p684_p2)
}
   0xa   :  { %s688_s23 = scalar_lea.vmem %s18_s13, 896  ;;  %p693_p4 = scmp.lt.s32.totalorder %s18_s13, %s18_s13 }
   0xb   :  { %p689_p3 = scmp.ne.s32.totalorder %s18_s13, %s688_s23  ;;  %p694_p5 = scmp.lt.s32.totalorder %s688_s23, %s688_s23 }
   0xd   :  { %p695_p6 = por %p694_p5, %p693_p4 }
   0xf   :  { %p696_p7 = pnand %p695_p6, %p689_p3 }
  0x11   :  { %699 = shalt.err (!%p696_p7)
}
  0x12   :  { %20 = dma.hbm_to_vmem [thread:$0]  %s824_s0, 896, %s18_s13, [#allocation3]  }
  0x13   :  { %s700_s28 = scalar_lea.hbm %s825_s1, 12544 }
  0x14   :  { %p701_p8 = scmp.ne.s32.totalorder %s825_s1, %s700_s28  ;;  %p704_p9 = scmp.lt.u32.totalorder %s700_s28, %s825_s1 }
  0x16   :  { %p706_p10 = pnand %p704_p9, %p701_p8 }
  0x18   :  { %709 = shalt.err (!%p706_p10)
}
  0x19   :  { %s710_s6 = scalar_lea.vmem %s778_s15, 12544  ;;  %p715_p12 = scmp.lt.s32.totalorder %s778_s15, %s778_s15 }
  0x1a   :  { %p711_p11 = scmp.ne.s32.totalorder %s778_s15, %s710_s6  ;;  %p716_p13 = scmp.lt.s32.totalorder %s710_s6, %s710_s6 }
  0x1c   :  { %p717_p0 = por %p716_p13, %p715_p12 }
  0x1e   :  { %p718_p1 = pnand %p717_p0, %p711_p11 }
  0x20   :  { %721 = shalt.err (!%p718_p1)
}
  0x21   :  { %s752_s0 = smov 128   ;;  %s753_s7 = smov 8  }
  0x22   :  { %32 = dma.hbm_to_vmem [thread:$0]  %s825_s1, 12544, %s778_s15, [#allocation6], %s752_s0, %s752_s0, %s753_s7  }
  0x23   :  { %744 = dma.done.wait [#allocation3], 896  }
  0x24   :  { %745 = vsyncadd [#allocation3], 4294966400 }
  0x25   :  { %746 = dma.done.wait [#allocation6], 12544  }
  0x26   :  { %747 = vsyncadd [#allocation6], 4294954752  ;;  %v64_v0 = vld [vmem:[#allocation5 + $0x80] sm:$0xff]  ;;  %v65_v1 = vld [vmem:[#allocation5 + $0x88] sm:$0xff]  ;;  %vm755_vm0 = vmmov 0   ;;  %vm153_vm1 = vcmask 130048  }
  0x27   :  { %v48_v2 = vld [vmem:[#allocation5] sm:$0xff]  ;;  %v571_v3 = vpack.c.bf16 %v65_v1, %v64_v0  ;;  %v49_v4 = vld [vmem:[#allocation5 + $0x8] sm:$0xff]  ;;  %v66_v11 = vld [vmem:[#allocation5 + $0x90] sm:$0xff]  ;;  %s757_s11 = smov [#allocation7]  }
  0x28   :  { %v96_v5 = vld [vmem:[#allocation5 + $0x180] sm:$0xff]  ;;  %v97_v6 = vld [vmem:[#allocation5 + $0x188] sm:$0xff]  ;;  %v573_v7 = vpack.c.bf16 %v49_v4, %v48_v2  ;;  %v67_v13 = vld [vmem:[#allocation5 + $0x98] sm:$0xff]  ;;  %s444_s12 = sshll.u32 %s757_s11, 4  ;;  %s445_s12 = int_to_ptr.vmem [resolvable:$true] %s444_s12 }
  0x29   :  { %v603_v8 = vpack.c.bf16 %v97_v6, %v96_v5  ;;  %v80_v9 = vld [vmem:[#allocation5 + $0x100] sm:$0xff]  ;;  %v81_v10 = vld [vmem:[#allocation5 + $0x108] sm:$0xff]  ;;  %572 = vmatprep.subr.bf16.mxu0 %v571_v3  ;;  %v50_v14 = vld [vmem:[#allocation5 + $0x10] sm:$0xff]  ;;  %v575_v16 = vpack.c.bf16 %v67_v13, %v66_v11  ;;  %s722_s13 = scalar_lea.vmem %s445_s12, 128  ;;  %p727_p3 = scmp.lt.s32.totalorder %s445_s12, %s445_s12 }
  0x2a   :  { %v605_v12 = vpack.c.bf16 %v81_v10, %v80_v9  ;;  %v51_v15 = vld [vmem:[#allocation5 + $0x18] sm:$0xff]  ;;  %574 = vmatpush3.bf16.msra.mxu0 %v573_v7  ;;  %v98_v18 = vld [vmem:[#allocation5 + $0x190] sm:$0xff]  ;;  %v68_v23 = vld [vmem:[#allocation5 + $0xa0] sm:$0xff]  ;;  %p723_p2 = scmp.ne.s32.totalorder %s445_s12, %s722_s13  ;;  %p728_p4 = scmp.lt.s32.totalorder %s722_s13, %s722_s13 }
  0x2b   :  { %604 = vmatprep.subr.bf16.mxu1 %v603_v8  ;;  %v577_v17 = vpack.c.bf16 %v51_v15, %v50_v14  ;;  %v99_v19 = vld [vmem:[#allocation5 + $0x198] sm:$0xff]  ;;  %v82_v20 = vld [vmem:[#allocation5 + $0x110] sm:$0xff]  ;;  %v69_v24 = vld [vmem:[#allocation5 + $0xa8] sm:$0xff]  ;;  %576 = vmatprep.subr.bf16.mxu0 %v575_v16 }
  0x2c   :  { %606 = vmatpush3.bf16.msra.mxu1 %v605_v12  ;;  %v607_v21 = vpack.c.bf16 %v99_v19, %v98_v18  ;;  %v83_v22 = vld [vmem:[#allocation5 + $0x118] sm:$0xff]  ;;  %v579_v26 = vpack.c.bf16 %v69_v24, %v68_v23  ;;  %v52_v27 = vld [vmem:[#allocation5 + $0x20] sm:$0xff]  ;;  %v53_v28 = vld [vmem:[#allocation5 + $0x28] sm:$0xff]  ;;  %p729_p5 = por %p728_p4, %p727_p3 }
  0x2d   :  { %v609_v25 = vpack.c.bf16 %v83_v22, %v82_v20  ;;  %v100_v29 = vld [vmem:[#allocation5 + $0x1a0] sm:$0xff]  ;;  %v101_v30 = vld [vmem:[#allocation5 + $0x1a8] sm:$0xff]  ;;  %v581_v33 = vpack.c.bf16 %v53_v28, %v52_v27  ;;  %v70_v35 = vld [vmem:[#allocation5 + $0xb0] sm:$0xff] }
  0x2e   :  { %608 = vmatprep.subr.bf16.mxu1 %v607_v21  ;;  %v84_v31 = vld [vmem:[#allocation5 + $0x120] sm:$0xff]  ;;  %v85_v32 = vld [vmem:[#allocation5 + $0x128] sm:$0xff]  ;;  %578 = vmatpush3.bf16.msra.mxu0 %v577_v17  ;;  %v611_v34 = vpack.c.bf16 %v101_v30, %v100_v29  ;;  %v71_v36 = vld [vmem:[#allocation5 + $0xb8] sm:$0xff]  ;;  %p730_p6 = pnand %p729_p5, %p723_p2 }
  0x2f   :  { %v54_v37 = vld [vmem:[#allocation5 + $0x30] sm:$0xff]  ;;  %580 = vmatprep.subr.bf16.mxu0 %v579_v26  ;;  %v613_v38 = vpack.c.bf16 %v85_v32, %v84_v31  ;;  %v583_v39 = vpack.c.bf16 %v71_v36, %v70_v35  ;;  %v55_v40 = vld [vmem:[#allocation5 + $0x38] sm:$0xff]  ;;  %v72_v46 = vld [vmem:[#allocation5 + $0xc0] sm:$0xff] }
  0x30   :  { %610 = vmatpush3.bf16.msra.mxu1 %v609_v25  ;;  %v102_v41 = vld [vmem:[#allocation5 + $0x1b0] sm:$0xff]  ;;  %v103_v42 = vld [vmem:[#allocation5 + $0x1b8] sm:$0xff]  ;;  %v73_v47 = vld [vmem:[#allocation5 + $0xc8] sm:$0xff]  ;;  %v585_v48 = vpack.c.bf16 %v55_v40, %v54_v37 }
  0x31   :  { %612 = vmatprep.subr.bf16.mxu1 %v611_v34  ;;  %v615_v43 = vpack.c.bf16 %v103_v42, %v102_v41  ;;  %v86_v44 = vld [vmem:[#allocation5 + $0x130] sm:$0xff]  ;;  %v87_v45 = vld [vmem:[#allocation5 + $0x138] sm:$0xff]  ;;  %v104_v49 = vld [vmem:[#allocation5 + $0x1c0] sm:$0xff]  ;;  %v587_v52 = vpack.c.bf16 %v73_v47, %v72_v46 }
  0x32   :  { %582 = vmatpush3.bf16.msra.mxu0 %v581_v33  ;;  %v105_v50 = vld [vmem:[#allocation5 + $0x1c8] sm:$0xff]  ;;  %v617_v51 = vpack.c.bf16 %v87_v45, %v86_v44  ;;  %v56_v53 = vld [vmem:[#allocation5 + $0x40] sm:$0xff]  ;;  %v74_v58 = vld [vmem:[#allocation5 + $0xd0] sm:$0xff] }
  0x33   :  { %584 = vmatprep.subr.bf16.mxu0 %v583_v39  ;;  %v57_v54 = vld [vmem:[#allocation5 + $0x48] sm:$0xff]  ;;  %v88_v55 = vld [vmem:[#allocation5 + $0x140] sm:$0xff]  ;;  %v619_v56 = vpack.c.bf16 %v105_v50, %v104_v49  ;;  %v75_v59 = vld [vmem:[#allocation5 + $0xd8] sm:$0xff]  ;;  %v754_v50 = vmov 0.0|0.0  }
  0x34   :  { %614 = vmatpush3.bf16.msra.mxu1 %v613_v38  ;;  %v89_v57 = vld [vmem:[#allocation5 + $0x148] sm:$0xff]  ;;  %v106_v60 = vld [vmem:[#allocation5 + $0x1d0] sm:$0xff]  ;;  %v107_v61 = vld [vmem:[#allocation5 + $0x1d8] sm:$0xff]  ;;  %v589_v62 = vpack.c.bf16 %v57_v54, %v56_v53  ;;  %v591_v0 = vpack.c.bf16 %v75_v59, %v74_v58 }
  0x35   :  { %616 = vmatprep.subr.bf16.mxu1 %v615_v43  ;;  %v621_v63 = vpack.c.bf16 %v89_v57, %v88_v55  ;;  %v58_v1 = vld [vmem:[#allocation5 + $0x50] sm:$0xff]  ;;  %v59_v2 = vld [vmem:[#allocation5 + $0x58] sm:$0xff]  ;;  %v623_v4 = vpack.c.bf16 %v107_v61, %v106_v60  ;;  %v76_v6 = vld [vmem:[#allocation5 + $0xe0] sm:$0xff]  ;;  %v756_v60 = vmov 0.0  }
  0x36   :  { %586 = vmatpush3.bf16.msra.mxu0 %v585_v48  ;;  %v90_v3 = vld [vmem:[#allocation5 + $0x150] sm:$0xff]  ;;  %v91_v5 = vld [vmem:[#allocation5 + $0x158] sm:$0xff]  ;;  %v77_v7 = vld [vmem:[#allocation5 + $0xe8] sm:$0xff]  ;;  %v593_v10 = vpack.c.bf16 %v59_v2, %v58_v1 }
  0x37   :  { %588 = vmatprep.subr.bf16.mxu0 %v587_v52  ;;  %v108_v8 = vld [vmem:[#allocation5 + $0x1e0] sm:$0xff]  ;;  %v109_v9 = vld [vmem:[#allocation5 + $0x1e8] sm:$0xff]  ;;  %v42_v12 = vld [vmem:[#allocation2 + $0x8] sm:$0xff]  ;;  %v625_v13 = vpack.c.bf16 %v91_v5, %v90_v3  ;;  %v595_v14 = vpack.c.bf16 %v77_v7, %v76_v6 }
  0x38   :  { %618 = vmatpush3.bf16.msra.mxu1 %v617_v51  ;;  %v60_v11 = vld [vmem:[#allocation5 + $0x60] sm:$0xff]  ;;  %v61_v15 = vld [vmem:[#allocation5 + $0x68] sm:$0xff]  ;;  %v627_v18 = vpack.c.bf16 %v109_v9, %v108_v8  ;;  %v78_v19 = vld [vmem:[#allocation5 + $0xf0] sm:$0xff]  ;;  %221 = vmatprep.mubr.f32.mxu0 %v42_v12 }
  0x39   :  { %620 = vmatprep.subr.bf16.mxu1 %v619_v56  ;;  %v92_v16 = vld [vmem:[#allocation5 + $0x160] sm:$0xff]  ;;  %v93_v17 = vld [vmem:[#allocation5 + $0x168] sm:$0xff]  ;;  %v79_v20 = vld [vmem:[#allocation5 + $0xf8] sm:$0xff]  ;;  %v597_v24 = vpack.c.bf16 %v61_v15, %v60_v11 }
  0x3a   :  { %590 = vmatpush3.bf16.msra.mxu0 %v589_v62  ;;  %v44_v21 = vld [vmem:[#allocation2 + $0x18] sm:$0xff]  ;;  %v110_v22 = vld [vmem:[#allocation5 + $0x1f0] sm:$0xff]  ;;  %v111_v23 = vld [vmem:[#allocation5 + $0x1f8] sm:$0xff]  ;;  %v629_v25 = vpack.c.bf16 %v93_v17, %v92_v16  ;;  %v599_v26 = vpack.c.bf16 %v79_v20, %v78_v19 }
  0x3b   :  { %592 = vmatprep.subr.bf16.mxu0 %v591_v0  ;;  %291 = vmatprep.mubr.f32.mxu1 %v44_v21  ;;  %v62_v27 = vld [vmem:[#allocation5 + $0x70] sm:$0xff]  ;;  %v63_v28 = vld [vmem:[#allocation5 + $0x78] sm:$0xff]  ;;  %v631_v30 = vpack.c.bf16 %v111_v23, %v110_v22  ;;  %v128_v32 = vld [vmem:[#allocation5 + $0x280] sm:$0xff] }
  0x3c   :  { %622 = vmatpush3.bf16.msra.mxu1 %v621_v63  ;;  %v94_v29 = vld [vmem:[#allocation5 + $0x170] sm:$0xff]  ;;  %v95_v31 = vld [vmem:[#allocation5 + $0x178] sm:$0xff]  ;;  %v129_v33 = vld [vmem:[#allocation5 + $0x288] sm:$0xff]  ;;  %v601_v34 = vpack.c.bf16 %v63_v28, %v62_v27 }
  0x3d   :  { %624 = vmatprep.subr.bf16.mxu1 %v623_v4  ;;  %v633_v35 = vpack.c.bf16 %v95_v31, %v94_v29  ;;  %v635_v36 = vpack.c.bf16 %v129_v33, %v128_v32  ;;  %v112_v37 = vld [vmem:[#allocation5 + $0x200] sm:$0xff]  ;;  %v113_v38 = vld [vmem:[#allocation5 + $0x208] sm:$0xff]  ;;  %v130_v39 = vld [vmem:[#allocation5 + $0x290] sm:$0xff] }
  0x3e   :  { %594 = vmatpush3.bf16.msra.mxu0 %v593_v10  ;;  %v131_v40 = vld [vmem:[#allocation5 + $0x298] sm:$0xff]  ;;  %v41_v41 = vld [vmem:[#allocation2] sm:$0xff]  ;;  %v637_v42 = vpack.c.bf16 %v113_v38, %v112_v37  ;;  %v114_v44 = vld [vmem:[#allocation5 + $0x210] sm:$0xff] }
  0x3f   :  { %596 = vmatprep.subr.bf16.mxu0 %v595_v14  ;;  %v43_v43 = vld [vmem:[#allocation2 + $0x10] sm:$0xff]  ;;  %v639_v45 = vpack.c.bf16 %v131_v40, %v130_v39  ;;  %v132_v47 = vld [vmem:[#allocation5 + $0x2a0] sm:$0xff]  ;;  %v133_v48 = vld [vmem:[#allocation5 + $0x2a8] sm:$0xff] }
  0x40   :  { %626 = vmatpush3.bf16.msra.mxu1 %v625_v13  ;;  %v115_v46 = vld [vmem:[#allocation5 + $0x218] sm:$0xff]  ;;  %v46_v49 = vld [vmem:[#allocation2 + $0x28] sm:$0xff]  ;;  %v144_v51 = vld [vmem:[#allocation5 + $0x300] sm:$0xff]  ;;  %v643_v55 = vpack.c.bf16 %v133_v48, %v132_v47 }
  0x41   :  { %628 = vmatprep.subr.bf16.mxu1 %v627_v18  ;;  %v145_v52 = vld [vmem:[#allocation5 + $0x308] sm:$0xff]  ;;  %v641_v54 = vpack.c.bf16 %v115_v46, %v114_v44  ;;  %v116_v56 = vld [vmem:[#allocation5 + $0x220] sm:$0xff]  ;;  %v134_v58 = vld [vmem:[#allocation5 + $0x2b0] sm:$0xff] }
  0x42   :  { %598 = vmatpush3.bf16.msra.mxu0 %v597_v24  ;;  %v668_v53 = vpack.c.bf16 %v145_v52, %v144_v51  ;;  %v117_v57 = vld [vmem:[#allocation5 + $0x228] sm:$0xff]  ;;  %v135_v59 = vld [vmem:[#allocation5 + $0x2b8] sm:$0xff]  ;;  %v118_v0 = vld [vmem:[#allocation5 + $0x230] sm:$0xff] }
  0x43   :  { %600 = vmatprep.subr.bf16.mxu0 %v599_v26  ;;  %v47_v61 = vld [vmem:[#allocation2 + $0x30] sm:$0xff]  ;;  %v645_v62 = vpack.c.bf16 %v117_v57, %v116_v56  ;;  %v647_v63 = vpack.c.bf16 %v135_v59, %v134_v58  ;;  %v136_v2 = vld [vmem:[#allocation5 + $0x2c0] sm:$0xff]  ;;  %v137_v3 = vld [vmem:[#allocation5 + $0x2c8] sm:$0xff] }
  0x44   :  { %630 = vmatpush3.bf16.msra.mxu1 %v629_v25  ;;  %v119_v1 = vld [vmem:[#allocation5 + $0x238] sm:$0xff]  ;;  %v651_v5 = vpack.c.bf16 %v137_v3, %v136_v2  ;;  %v120_v6 = vld [vmem:[#allocation5 + $0x240] sm:$0xff]  ;;  %v121_v7 = vld [vmem:[#allocation5 + $0x248] sm:$0xff] }
  0x45   :  { %632 = vmatprep.subr.bf16.mxu1 %v631_v30  ;;  %v649_v4 = vpack.c.bf16 %v119_v1, %v118_v0  ;;  %v138_v8 = vld [vmem:[#allocation5 + $0x2d0] sm:$0xff]  ;;  %v139_v9 = vld [vmem:[#allocation5 + $0x2d8] sm:$0xff]  ;;  %v653_v10 = vpack.c.bf16 %v121_v7, %v120_v6  ;;  %v140_v14 = vld [vmem:[#allocation5 + $0x2e0] sm:$0xff] }
  0x46   :  { %602 = vmatpush3.bf16.msra.mxu0 %v601_v34  ;;  %v655_v11 = vpack.c.bf16 %v139_v9, %v138_v8  ;;  %v122_v12 = vld [vmem:[#allocation5 + $0x250] sm:$0xff]  ;;  %v123_v13 = vld [vmem:[#allocation5 + $0x258] sm:$0xff]  ;;  %v141_v15 = vld [vmem:[#allocation5 + $0x2e8] sm:$0xff] }
  0x47   :  { %636 = vmatprep.subr.bf16.mxu0 %v635_v36  ;;  %v657_v16 = vpack.c.bf16 %v123_v13, %v122_v12  ;;  %v659_v17 = vpack.c.bf16 %v141_v15, %v140_v14  ;;  %v124_v18 = vld [vmem:[#allocation5 + $0x260] sm:$0xff]  ;;  %v125_v19 = vld [vmem:[#allocation5 + $0x268] sm:$0xff]  ;;  %v142_v20 = vld [vmem:[#allocation5 + $0x2f0] sm:$0xff] }
  0x48   :  { %634 = vmatpush3.bf16.msra.mxu1 %v633_v35  ;;  %v143_v21 = vld [vmem:[#allocation5 + $0x2f8] sm:$0xff]  ;;  %v661_v22 = vpack.c.bf16 %v125_v19, %v124_v18  ;;  %v126_v24 = vld [vmem:[#allocation5 + $0x270] sm:$0xff]  ;;  %v45_v27 = vld [vmem:[#allocation2 + $0x20] sm:$0xff] }
  0x49   :  { %667 = vmatprep.subr.bf16.mxu1 %v754_v50  ;;  %222 = vmatmul.mubr.f32.vlgmr.msra.gmra.mrb[0].mxu0 %v41_v41  ;;  %v663_v23 = vpack.c.bf16 %v143_v21, %v142_v20  ;;  %v127_v25 = vld [vmem:[#allocation5 + $0x278] sm:$0xff]  ;;  %v454_v29 = vld [vmem:[%s826_s2] ss:$0 sm:$0xff] }
  0x4a   :  { %638 = vmatpush3.bf16.msra.mxu0 %v637_v42  ;;  %361 = vmatprep.mubr.f32.mxu0 %v46_v49  ;;  %v665_v26 = vpack.c.bf16 %v127_v25, %v126_v24 }
  0x4b   :  { %292 = vmatmul.mubr.f32.vlgmr.msra.gmra.mrb[0].mxu1 %v43_v43  ;;  %640 = vmatprep.subr.bf16.mxu0 %v639_v45 }
  0x4c   :  { %669 = vmatpush3.bf16.msra.mxu1 %v668_v53  ;;  %568 = vmatprep.mubr.msk.f32.mxu1 %vm755_vm0, %v756_v60 }
  0x4e   :  { %642 = vmatpush3.bf16.msra.mxu0 %v641_v54 }
  0x4f   :  { %644 = vmatprep.subr.bf16.mxu0 %v643_v55  ;;  %569 = vmatmul.mubr.msk.f32.vlgmr.msra.gmra.mrb[2].mxu1 %vm153_vm1, %v47_v61 }
  0x52   :  { %646 = vmatpush3.bf16.msra.mxu0 %v645_v62 }
  0x53   :  { %648 = vmatprep.subr.bf16.mxu0 %v647_v63 }
  0x56   :  { %650 = vmatpush3.bf16.msra.mxu0 %v649_v4 }
  0x57   :  { %652 = vmatprep.subr.bf16.mxu0 %v651_v5 }
  0x5a   :  { %654 = vmatpush3.bf16.msra.mxu0 %v653_v10 }
  0x5b   :  { %656 = vmatprep.subr.bf16.mxu0 %v655_v11 }
  0x5e   :  { %658 = vmatpush3.bf16.msra.mxu0 %v657_v16 }
  0x5f   :  { %660 = vmatprep.subr.bf16.mxu0 %v659_v17 }
  0x62   :  { %662 = vmatpush3.bf16.msra.mxu0 %v661_v22 }
  0x63   :  { %664 = vmatprep.subr.bf16.mxu0 %v663_v23 }
  0x66   :  { %666 = vmatpush3.bf16.msra.mxu0 %v665_v26 }
  0x69   :  { %362 = vmatmul.mubr.f32.vlgmr.msra.gmra.mrb[2].mxu0 %v45_v27 }
 0x11c   :  { %v488_v28 = vpop.f32.mrb[0].mxu0 }
 0x11d   :  { %v489_v30 = vpop.f32.mrb[1].mxu0 }
 0x11e   :  { %v523_v31 = vpop.f32.mrb[0].mxu1  ;;  %v490_v32 = vadd.f32 %v489_v30, %v488_v28 }
 0x11f   :  { %v524_v33 = vpop.f32.mrb[1].mxu1 }
 0x120   :  { %v525_v34 = vadd.f32 %v524_v33, %v523_v31  ;;  %v224_v35 = vadd.f32 %v490_v32, %v454_v29 }
 0x122   :  { %v294_v36 = vadd.f32 %v525_v34, %v224_v35  ;;  %v433_v37 = vpop.f32.mrb[2].mxu1 }
 0x123   :  { %v570_v38 = vpop.f32.mrb[3].mxu1 }
 0x13c   :  { %v558_v39 = vpop.f32.mrb[2].mxu0 }
 0x13d   :  { %v559_v40 = vpop.f32.mrb[3].mxu0 }
 0x13e   :  { %v560_v41 = vadd.f32 %v559_v40, %v558_v39 }
 0x140   :  { %v364_v42 = vadd.f32 %v560_v41, %v294_v36 }
 0x142   :  { %v434_v43 = vadd.f32 %v433_v37, %v364_v42 }
 0x144   :  { %437 = vst [vmem:[#allocation7] sm:$0xff] %v434_v43 }
 0x145   :  { %733 = shalt.err (!%p730_p6)
}
 0x146   :  { %s734_s15 = scalar_lea.hbm %s827_s3, 128 }
 0x147   :  { %p735_p7 = scmp.ne.s32.totalorder %s827_s3, %s734_s15  ;;  %p738_p8 = scmp.lt.u32.totalorder %s734_s15, %s827_s3 }
 0x149   :  { %p740_p9 = pnand %p738_p8, %p735_p7 }
 0x14b   :  { %743 = shalt.err (!%p740_p9)
}
 0x14c   :  { %447 = dma.vmem_to_hbm [thread:$0]  %s445_s12, 128, %s827_s3, [#allocation4]  }
 0x14d   :  { %748 = dma.done.wait [#allocation4], 128  }
 0x14e   :  { %749 = vsyncadd [#allocation4], 4294967168 }
 0x14f   :  { %451 = vsyncpa [#allocation3], 1 }
 0x150   :  { %452 = vsyncpa [#allocation6], 1 }
 0x151   :  { %453 = vsyncpa [#allocation4], 1 }

</bundles_post_ra>
